<compile_context>
chip_gen: v7x
topology: tpu7x:2x2x1
jax: 0.10.0
libtpu: 0.0.40
codegen_flags: <defaults>
</compile_context>

<pallas_src>
import jax
import jax.numpy as jnp
from jax.experimental import pallas as pl
from jax.experimental.pallas import tpu as pltpu


_SMALL_BATCH_FALLBACK = 512   # below this, dispatch overhead beats the kernel
_MEGACORE_SPLIT_MIN_B = 1024  # guarantee >=2 grid steps so v7x can use both TCs


def _chip_tile_and_vmem():
    """Pick batch-tile cap and scoped-VMEM limit per TPU generation.

    Budget assumes Mosaic lane-pads the 32-wide activation buffers to 128
    lanes (worst case ~5 KB/row f32, double-buffered inputs + temps):
      v5e : tb=4096  (~20 MiB)  -- deepest HBM-bound; bigger tiles don't help
      v6e : tb=8192  (~40 MiB)  -- 128 MiB physical VMEM, plenty of headroom
      v7x : tb=8192  (~40 MiB)  -- only 64 MiB physical, do NOT go to 16384
    Unknown chips get conservative defaults (tile 4096, compiler-default VMEM).
    """
    try:
        kind = jax.devices()[0].device_kind.lower()
    except Exception:
        kind = ""
    if "v7" in kind or "tpu7" in kind or "7x" in kind:
        return 8192, 48 * 1024 * 1024
    if "v6" in kind:
        return 8192, 96 * 1024 * 1024
    if "v5" in kind:
        return 4096, 64 * 1024 * 1024
    return 4096, None


def int_model_kernel(enr_ref, tst_ref, cm_ref,
                     w1_ref, b1_ref, w2_ref, b2_ref, wout_ref,
                     o_ref):
    # squeeze(dim=1) handled by BlockSpec; activation refs are (TB, D_*) and
    # may be bf16 (HBM savings) -- widen to f32 in-vreg (cheap VPU cast), then
    # lane-concat (96 <= 128) so layer 1 is a single fused K=96 MXU push.
    f32 = jnp.float32
    x = jnp.concatenate([enr_ref[...].astype(f32),
                         tst_ref[...].astype(f32),
                         cm_ref[...].astype(f32)], axis=-1)

    # enh_DNN layer 1: Linear(code_dim -> l_nodes[0]) + LeakyReLU(0.3)
    h = jnp.dot(x, w1_ref[...], preferred_element_type=f32) + b1_ref[...]
    h = jnp.where(h >= 0, h, 0.3 * h)

    # enh_DNN layer 2: Linear(l_nodes[0] -> l_nodes[1]) + LeakyReLU(0.3)
    h = jnp.dot(h, w2_ref[...], preferred_element_type=f32) + b2_ref[...]
    h = jnp.where(h >= 0, h, 0.3 * h)

    # fc_out: Linear(l_nodes[1] -> 2), no bias -- single (TB, 2) store per tile.
    o_ref[...] = jnp.dot(h, wout_ref[...],
                         preferred_element_type=f32).astype(o_ref.dtype)


def _jax_forward(embd_asv_enr, embd_asv_tst, embd_cm, params):
    """Fused pure-XLA path for small batches (latency-optimal at tiny B)."""
    w1, b1, w2, b2, wout = params
    x = jnp.concatenate([jnp.squeeze(embd_asv_enr, 1),
                         jnp.squeeze(embd_asv_tst, 1),
                         jnp.squeeze(embd_cm, 1)], axis=1)
    h = jnp.dot(x, w1, preferred_element_type=jnp.float32) + b1
    h = jnp.where(h >= 0, h, 0.3 * h)
    h = jnp.dot(h, w2, preferred_element_type=jnp.float32) + b2
    h = jnp.where(h >= 0, h, 0.3 * h)
    return jnp.dot(h, wout, preferred_element_type=jnp.float32)


def int_model_forward(embd_asv_enr, embd_asv_tst, embd_cm, params,
                      *, use_pallas=None):
    """embd_* : (B, 1, D_*) float32 or bfloat16  ->  logits (B, 2) float32."""
    w1, b1, w2, b2, wout = params
    B = embd_asv_enr.shape[0]
    d_enr = embd_asv_enr.shape[-1]
    d_tst = embd_asv_tst.shape[-1]
    d_cm = embd_cm.shape[-1]
    n_hid1 = w1.shape[1]
    n_hid2 = w2.shape[1]
    n_out = wout.shape[1]
    code_dim = d_enr + d_tst + d_cm

    if use_pallas is None:
        use_pallas = B > _SMALL_BATCH_FALLBACK
    if not use_pallas:
        return _jax_forward(embd_asv_enr, embd_asv_tst, embd_cm, params)

    tb_max, vmem_limit = _chip_tile_and_vmem()
    if B > tb_max:
        tb = tb_max
    elif B >= _MEGACORE_SPLIT_MIN_B:
        # >=2 grid steps so ("parallel",) can actually shard across two TCs.
        tb = ((B + 1) // 2 + 7) // 8 * 8
    else:
        tb = B  # full-batch tile; block dims equal to array dims are always legal
    grid = (pl.cdiv(B, tb),)
    # Ragged last tile: padded rows compute on garbage and are never written
    # back (pure row-wise math -- no cross-row reduction to poison).

    def act_spec(d):
        # (B, 1, D): squeeze the middle dim via BlockSpec -> kernel sees (tb, D).
        return pl.BlockSpec((tb, pl.Squeezed(), d), lambda i: (i, 0, 0))

    def const_spec(shape):
        # Same block every grid step -> stays VMEM-resident (no re-DMA).
        return pl.BlockSpec(shape, lambda i: (0, 0))

    act_itemsize = jnp.result_type(embd_asv_enr.dtype, embd_asv_tst.dtype,
                                   embd_cm.dtype).itemsize
    flops = 2 * B * (code_dim * n_hid1 + n_hid1 * n_hid2 + n_hid2 * n_out)
    weight_bytes = 4 * (code_dim * n_hid1 + n_hid1
                        + n_hid1 * n_hid2 + n_hid2
                        + n_hid2 * n_out)
    bytes_accessed = act_itemsize * B * code_dim + 4 * B * n_out + weight_bytes

    cp_kwargs = dict(dimension_semantics=("parallel",))
    if vmem_limit is not None:
        cp_kwargs["vmem_limit_bytes"] = vmem_limit

    return pl.pallas_call(
        int_model_kernel,
        out_shape=jax.ShapeDtypeStruct((B, n_out), jnp.float32),
        grid=grid,
        in_specs=[
            act_spec(d_enr), act_spec(d_tst), act_spec(d_cm),
            const_spec(w1.shape), const_spec(b1.shape),
            const_spec(w2.shape), const_spec(b2.shape),
            const_spec(wout.shape),
        ],
        out_specs=pl.BlockSpec((tb, n_out), lambda i: (i, 0)),
        compiler_params=pltpu.CompilerParams(**cp_kwargs),
        cost_estimate=pl.CostEstimate(
            flops=flops, transcendentals=0, bytes_accessed=bytes_accessed),
    )(embd_asv_enr, embd_asv_tst, embd_cm, w1, b1, w2, b2, wout)


def init_params(key, d_enr, d_tst, d_cm, l_nodes, n_out=2):
    """Deterministic PyTorch-style init (U(-1/sqrt(fan_in), 1/sqrt(fan_in))).

    Weights are stored (in_features, out_features) so the kernel computes x @ W,
    equivalent to torch's x @ W.T with W stored (out, in). Layer-1 weight is
    kept fused: rows [0:d_enr] multiply enr, [d_enr:d_enr+d_tst] multiply tst,
    the rest multiply cm -- identical to concat([enr,tst,cm]) @ W1.
    """
    code_dim = d_enr + d_tst + d_cm
    keys = jax.random.split(key, 5)

    def uni(k, shape, fan_in):
        bound = 1.0 / jnp.sqrt(float(fan_in))
        return jax.random.uniform(k, shape, jnp.float32, -bound, bound)

    w1 = uni(keys[0], (code_dim, l_nodes[0]), code_dim)
    b1 = uni(keys[1], (1, l_nodes[0]), code_dim)
    w2 = uni(keys[2], (l_nodes[0], l_nodes[1]), l_nodes[0])
    b2 = uni(keys[3], (1, l_nodes[1]), l_nodes[0])
    wout = uni(keys[4], (l_nodes[1], n_out), l_nodes[1])
    return (w1, b1, w2, b2, wout)


def reference_forward(embd_asv_enr, embd_asv_tst, embd_cm, params):
    """Pure-JAX reference matching the PyTorch forward."""
    w1, b1, w2, b2, wout = params
    enr = jnp.squeeze(embd_asv_enr, 1)
    tst = jnp.squeeze(embd_asv_tst, 1)
    cm = jnp.squeeze(embd_cm, 1)
    x = jnp.concatenate([enr, tst, cm], axis=1)
    h = x @ w1 + b1
    h = jnp.where(h >= 0, h, 0.3 * h)
    h = h @ w2 + b2
    h = jnp.where(h >= 0, h, 0.3 * h)
    return h @ wout


if __name__ == "__main__":
    # Small shapes consistent with the module:
    #   each embedding (B, 1, 32), code_dim = 96, dnn_l_nodes = [64, 32]
    D_ENR = D_TST = D_CM = 32
    L_NODES = [64, 32]

    key = jax.random.PRNGKey(0)
    k_enr, k_tst, k_cm, k_par = jax.random.split(key, 4)
    params = init_params(k_par, D_ENR, D_TST, D_CM, L_NODES, n_out=2)

    # --- Test 1: tiny f32 batch, forced through the Pallas kernel ------------
    B = 2
    embd_asv_enr = jax.random.normal(k_enr, (B, 1, D_ENR), jnp.float32)
    embd_asv_tst = jax.random.normal(k_tst, (B, 1, D_TST), jnp.float32)
    embd_cm = jax.random.normal(k_cm, (B, 1, D_CM), jnp.float32)

    out = int_model_forward(embd_asv_enr, embd_asv_tst, embd_cm, params,
                            use_pallas=True)
    out = jax.block_until_ready(out)
    ref = reference_forward(embd_asv_enr, embd_asv_tst, embd_cm, params)
    assert out.shape == (B, 2), out.shape
    assert jnp.allclose(out, ref, atol=1e-5, rtol=1e-5), (out, ref)

    # --- Test 2: bf16 activations (halved HBM bytes), multi-row tile ---------
    B2 = 256
    k2 = jax.random.split(jax.random.PRNGKey(1), 3)
    enr2 = jax.random.normal(k2[0], (B2, 1, D_ENR), jnp.float32).astype(jnp.bfloat16)
    tst2 = jax.random.normal(k2[1], (B2, 1, D_TST), jnp.float32).astype(jnp.bfloat16)
    cm2 = jax.random.normal(k2[2], (B2, 1, D_CM), jnp.float32).astype(jnp.bfloat16)

    out2 = int_model_forward(enr2, tst2, cm2, params, use_pallas=True)
    out2 = jax.block_until_ready(out2)
    ref2 = reference_forward(enr2, tst2, cm2, params)
    assert out2.shape == (B2, 2), out2.shape
    assert jnp.allclose(out2, ref2, atol=1e-2, rtol=1e-2), (out2, ref2)

    # --- Test 3: small-batch auto-dispatch takes the fused pure-XLA path -----
    out3 = int_model_forward(embd_asv_enr, embd_asv_tst, embd_cm, params)
    out3 = jax.block_until_ready(out3)
    assert jnp.allclose(out3, ref, atol=1e-5, rtol=1e-5), (out3, ref)

    print("KERNEL_OK")
</pallas_src>

<mosaic_0001>
module attributes {stable_mosaic.version = 11 : i64} {
  func.func @int_model_kernel(%arg0: i32, %arg1: memref<2x1x32xf32, #tpu.memory_space<vmem>>, %arg2: memref<2x1x32xf32, #tpu.memory_space<vmem>>, %arg3: memref<2x1x32xf32, #tpu.memory_space<vmem>>, %arg4: memref<96x64xf32, #tpu.memory_space<vmem>>, %arg5: memref<1x64xf32, #tpu.memory_space<vmem>>, %arg6: memref<64x32xf32, #tpu.memory_space<vmem>>, %arg7: memref<1x32xf32, #tpu.memory_space<vmem>>, %arg8: memref<32x2xf32, #tpu.memory_space<vmem>>, %arg9: memref<2x2xf32, #tpu.memory_space<vmem>>) attributes {dimension_semantics = [#tpu.dimension_semantics<parallel>], iteration_bounds = array<i64: 1>, scalar_prefetch = 0 : i64, scratch_operands = 0 : i64, tpu.core_type = #tpu.core_type<tc>, window_params = [{transform_indices = @transform_0, window_bounds = array<i64: 2, 1, 32>}, {transform_indices = @transform_1, window_bounds = array<i64: 2, 1, 32>}, {transform_indices = @transform_2, window_bounds = array<i64: 2, 1, 32>}, {pipeline_mode = #tpu.pipeline_mode<synchronous>, transform_indices = @transform_3, window_bounds = array<i64: 96, 64>}, {pipeline_mode = #tpu.pipeline_mode<synchronous>, transform_indices = @transform_4, window_bounds = array<i64: 1, 64>}, {pipeline_mode = #tpu.pipeline_mode<synchronous>, transform_indices = @transform_5, window_bounds = array<i64: 64, 32>}, {pipeline_mode = #tpu.pipeline_mode<synchronous>, transform_indices = @transform_6, window_bounds = array<i64: 1, 32>}, {pipeline_mode = #tpu.pipeline_mode<synchronous>, transform_indices = @transform_7, window_bounds = array<i64: 32, 2>}, {transform_indices = @transform_8, window_bounds = array<i64: 2, 2>}]} {
    %c0 = arith.constant 0 : index
    %c0_0 = arith.constant 0 : index
    %c0_1 = arith.constant 0 : index
    %0 = vector.load %arg1[%c0, %c0_0, %c0_1] : memref<2x1x32xf32, #tpu.memory_space<vmem>>, vector<2x1x32xf32>
    %1 = vector.shape_cast %0 : vector<2x1x32xf32> to vector<2x32xf32>
    %c0_2 = arith.constant 0 : index
    %c0_3 = arith.constant 0 : index
    %c0_4 = arith.constant 0 : index
    %2 = vector.load %arg2[%c0_2, %c0_3, %c0_4] : memref<2x1x32xf32, #tpu.memory_space<vmem>>, vector<2x1x32xf32>
    %3 = vector.shape_cast %2 : vector<2x1x32xf32> to vector<2x32xf32>
    %c0_5 = arith.constant 0 : index
    %c0_6 = arith.constant 0 : index
    %c0_7 = arith.constant 0 : index
    %4 = vector.load %arg3[%c0_5, %c0_6, %c0_7] : memref<2x1x32xf32, #tpu.memory_space<vmem>>, vector<2x1x32xf32>
    %5 = vector.shape_cast %4 : vector<2x1x32xf32> to vector<2x32xf32>
    %6 = tpu.concatenate %1, %3, %5 in 1 : vector<2x32xf32>, vector<2x32xf32>, vector<2x32xf32> -> vector<2x96xf32>
    %c0_8 = arith.constant 0 : index
    %c0_9 = arith.constant 0 : index
    %7 = vector.load %arg4[%c0_8, %c0_9] : memref<96x64xf32, #tpu.memory_space<vmem>>, vector<96x64xf32>
    %cst = arith.constant dense<0.000000e+00> : vector<2x64xf32>
    %8 = tpu.matmul %6, %7, %cst {dimension_numbers = #tpu.dot_dimension_numbers<[1], [0], [0], [1], [0, 0, 1, 1], [], []>} : vector<2x96xf32>, vector<96x64xf32>, vector<2x64xf32> -> vector<2x64xf32>
    %c0_10 = arith.constant 0 : index
    %c0_11 = arith.constant 0 : index
    %9 = vector.load %arg5[%c0_10, %c0_11] : memref<1x64xf32, #tpu.memory_space<vmem>>, vector<1x64xf32>
    %10 = vector.broadcast %9 : vector<1x64xf32> to vector<2x64xf32>
    %11 = arith.addf %8, %10 : vector<2x64xf32>
    %cst_12 = arith.constant 0.000000e+00 : f32
    %12 = vector.broadcast %cst_12 : f32 to vector<2x64xf32>
    %13 = arith.cmpf oge, %11, %12 : vector<2x64xf32>
    %cst_13 = arith.constant 3.000000e-01 : f32
    %14 = vector.broadcast %cst_13 : f32 to vector<2x64xf32>
    %15 = arith.mulf %14, %11 : vector<2x64xf32>
    %16 = arith.select %13, %11, %15 : vector<2x64xi1>, vector<2x64xf32>
    %c0_14 = arith.constant 0 : index
    %c0_15 = arith.constant 0 : index
    %17 = vector.load %arg6[%c0_14, %c0_15] : memref<64x32xf32, #tpu.memory_space<vmem>>, vector<64x32xf32>
    %cst_16 = arith.constant dense<0.000000e+00> : vector<2x32xf32>
    %18 = tpu.matmul %16, %17, %cst_16 {dimension_numbers = #tpu.dot_dimension_numbers<[1], [0], [0], [1], [0, 0, 1, 1], [], []>} : vector<2x64xf32>, vector<64x32xf32>, vector<2x32xf32> -> vector<2x32xf32>
    %c0_17 = arith.constant 0 : index
    %c0_18 = arith.constant 0 : index
    %19 = vector.load %arg7[%c0_17, %c0_18] : memref<1x32xf32, #tpu.memory_space<vmem>>, vector<1x32xf32>
    %20 = vector.broadcast %19 : vector<1x32xf32> to vector<2x32xf32>
    %21 = arith.addf %18, %20 : vector<2x32xf32>
    %cst_19 = arith.constant 0.000000e+00 : f32
    %22 = vector.broadcast %cst_19 : f32 to vector<2x32xf32>
    %23 = arith.cmpf oge, %21, %22 : vector<2x32xf32>
    %cst_20 = arith.constant 3.000000e-01 : f32
    %24 = vector.broadcast %cst_20 : f32 to vector<2x32xf32>
    %25 = arith.mulf %24, %21 : vector<2x32xf32>
    %26 = arith.select %23, %21, %25 : vector<2x32xi1>, vector<2x32xf32>
    %c0_21 = arith.constant 0 : index
    %c0_22 = arith.constant 0 : index
    %27 = vector.load %arg8[%c0_21, %c0_22] : memref<32x2xf32, #tpu.memory_space<vmem>>, vector<32x2xf32>
    %cst_23 = arith.constant dense<0.000000e+00> : vector<2x2xf32>
    %28 = tpu.matmul %26, %27, %cst_23 {dimension_numbers = #tpu.dot_dimension_numbers<[1], [0], [0], [1], [0, 0, 1, 1], [], []>} : vector<2x32xf32>, vector<32x2xf32>, vector<2x2xf32> -> vector<2x2xf32>
    %c0_24 = arith.constant 0 : index
    %c0_25 = arith.constant 0 : index
    %29 = vector.load %arg9[%c0_24, %c0_25] : memref<2x2xf32, #tpu.memory_space<vmem>>, vector<2x2xf32>
    tpu.vector_store %arg9[%c0_24, %c0_25], %28 {strides = array<i32>} : memref<2x2xf32, #tpu.memory_space<vmem>>, vector<2x2xf32>,
    return
  }
  func.func @transform_0(%arg0: i32) -> (i32, i32, i32) {
    %c0_i32 = arith.constant 0 : i32
    %c0_i32_0 = arith.constant 0 : i32
    %c0_i32_1 = arith.constant 0 : i32
    return %arg0, %c0_i32, %c0_i32_0 : i32, i32, i32
  }
  func.func @transform_1(%arg0: i32) -> (i32, i32, i32) {
    %c0_i32 = arith.constant 0 : i32
    %c0_i32_0 = arith.constant 0 : i32
    %c0_i32_1 = arith.constant 0 : i32
    return %arg0, %c0_i32, %c0_i32_0 : i32, i32, i32
  }
  func.func @transform_2(%arg0: i32) -> (i32, i32, i32) {
    %c0_i32 = arith.constant 0 : i32
    %c0_i32_0 = arith.constant 0 : i32
    %c0_i32_1 = arith.constant 0 : i32
    return %arg0, %c0_i32, %c0_i32_0 : i32, i32, i32
  }
  func.func @transform_3(%arg0: i32) -> (i32, i32) {
    %c0_i32 = arith.constant 0 : i32
    %c0_i32_0 = arith.constant 0 : i32
    %c0_i32_1 = arith.constant 0 : i32
    return %c0_i32, %c0_i32_0 : i32, i32
  }
  func.func @transform_4(%arg0: i32) -> (i32, i32) {
    %c0_i32 = arith.constant 0 : i32
    %c0_i32_0 = arith.constant 0 : i32
    %c0_i32_1 = arith.constant 0 : i32
    return %c0_i32, %c0_i32_0 : i32, i32
  }
  func.func @transform_5(%arg0: i32) -> (i32, i32) {
    %c0_i32 = arith.constant 0 : i32
    %c0_i32_0 = arith.constant 0 : i32
    %c0_i32_1 = arith.constant 0 : i32
    return %c0_i32, %c0_i32_0 : i32, i32
  }
  func.func @transform_6(%arg0: i32) -> (i32, i32) {
    %c0_i32 = arith.constant 0 : i32
    %c0_i32_0 = arith.constant 0 : i32
    %c0_i32_1 = arith.constant 0 : i32
    return %c0_i32, %c0_i32_0 : i32, i32
  }
  func.func @transform_7(%arg0: i32) -> (i32, i32) {
    %c0_i32 = arith.constant 0 : i32
    %c0_i32_0 = arith.constant 0 : i32
    %c0_i32_1 = arith.constant 0 : i32
    return %c0_i32, %c0_i32_0 : i32, i32
  }
  func.func @transform_8(%arg0: i32) -> (i32, i32) {
    %c0_i32 = arith.constant 0 : i32
    %c0_i32_0 = arith.constant 0 : i32
    return %arg0, %c0_i32 : i32, i32
  }
}

</mosaic_0001>

<bundles_post_ra>
// kernel: tpu_custom_call.1
= control target key start
LH: loop header
LB: loop body
LE: loop exit
PB: predicated region body
PF: predicated region fallthrough
CT: control target
= control target key end

     0   :  { %v42_v2 = vlaneseq  ;;  %v534_v3 = vmov 1966171168   ;;  %v535_v14 = vmov 0.0|0.0   ;;  %vm536_vm0 = vmmov 0   ;;  %s724_s0 = inlined_call_operand.vmem [shape: f32[2,1,32], index: 0, kind: input, shape index: {}]   ;;  %s725_s1 = inlined_call_operand.vmem [shape: f32[2,1,32], index: 1, kind: input, shape index: {}]   ;;  %s726_s2 = inlined_call_operand.vmem [shape: f32[2,1,32], index: 2, kind: input, shape index: {}]   ;;  %s727_s3 = inlined_call_operand.vmem [shape: f32[96,64], index: 3, kind: input, shape index: {}]   ;;  %s728_s4 = inlined_call_operand.vmem [shape: f32[1,64], index: 4, kind: input, shape index: {}]   ;;  %s729_s5 = inlined_call_operand.vmem [shape: f32[64,32], index: 5, kind: input, shape index: {}]   ;;  %s730_s6 = inlined_call_operand.vmem [shape: f32[1,32], index: 6, kind: input, shape index: {}]   ;;  %s731_s7 = inlined_call_operand.vmem [shape: f32[32,2], index: 7, kind: input, shape index: {}]   ;;  %s732_s8 = inlined_call_operand.hbm [shape: f32[2,2], index: 8, kind: output, shape index: {}]  }
   0x1   :  { %v32_v0 = vld [vmem:[%s725_s1] sm:$0x1]  ;;  %v33_v1 = vld [vmem:[%s725_s1 + $0x1] sm:$0x1]  ;;  %v40_v4 = vunpack.c.l.s4 %v534_v3  ;;  %v99_v10 = vld [vmem:[%s727_s3 + $0x8] sm:$0xff]  ;;  %467 = vmatprep.subr.bf16.mxu0 %v535_v14  ;;  %485 = vmatprep.subr.bf16.mxu1 %v535_v14  ;;  %v537_v19 = vmov 0.0  }
   0x2   :  { %v34_v5 = vld [vmem:[%s726_s2] sm:$0x1]  ;;  %v35_v6 = vld [vmem:[%s726_s2 + $0x1] sm:$0x1]  ;;  %v43_v7 = vshrl.u32 %v42_v2, 7  ;;  %v56_v8 = vcombine.low %v32_v0, %v33_v1  ;;  %v100_v11 = vld [vmem:[%s727_s3 + $0x10] sm:$0xff]  ;;  %434 = vmatprep.mubr.msk.f32.mxu0 %vm536_vm0, %v537_v19  ;;  %453 = vmatprep.mubr.msk.f32.mxu1 %vm536_vm0, %v537_v19 }
   0x3   :  { %v98_v9 = vld [vmem:[%s727_s3] sm:$0xff]  ;;  %v41_v12 = vunpack.c.0.s8 %v40_v4  ;;  %v76_v13 = vcombine.low %v34_v5, %v35_v6  ;;  %v101_v16 = vld [vmem:[%s727_s3 + $0x18] sm:$0xff]  ;;  %v103_v21 = vld [vmem:[%s727_s3 + $0x28] sm:$0xff] }
   0x4   :  { %v468_v15 = vpack.c.bf16 %v99_v10, %v98_v9  ;;  %v471_v18 = vpack.c.bf16 %v101_v16, %v100_v11  ;;  %v102_v20 = vld [vmem:[%s727_s3 + $0x20] sm:$0xff]  ;;  %v195_v25 = vld [vmem:[%s729_s5 + $0x8] sm:$0xff]  ;;  %v196_v26 = vld [vmem:[%s729_s5 + $0x10] sm:$0xff] }
   0x5   :  { %v612_v17 = vsub.s32 %v41_v12, %v43_v7  ;;  %v194_v22 = vld [vmem:[%s729_s5] sm:$0xff]  ;;  %v197_v27 = vld [vmem:[%s729_s5 + $0x18] sm:$0xff]  ;;  %v474_v30 = vpack.c.bf16 %v103_v21, %v102_v20 }
   0x6   :  { %469 = vmatpush3.bf16.msra.mxu0 %v468_v15  ;;  %v486_v28 = vpack.c.bf16 %v195_v25, %v194_v22 }
   0x7   :  { %470 = vmatprep.subr.bf16.mxu0 %v535_v14  ;;  %v63_v23 = vrot.slane %v56_v8, %v612_v17  ;;  %v83_v24 = vrot.slane %v76_v13, %v612_v17 }
   0x9   :  { %v70_v29 = vrot.slane %v63_v23, %v612_v17 }
   0xa   :  { %472 = vmatpush3.bf16.msra.mxu0 %v471_v18 }
   0xb   :  { %13 = vsyncpa [#allocation3], 0  ;;  %473 = vmatprep.subr.bf16.mxu0 %v535_v14  ;;  %v104_v31 = vld [vmem:[%s727_s3 + $0x30] sm:$0xff]  ;;  %v105_v32 = vld [vmem:[%s727_s3 + $0x38] sm:$0xff]  ;;  %487 = vmatpush3.bf16.msra.mxu1 %v486_v28  ;;  %v489_v33 = vpack.c.bf16 %v197_v27, %v196_v26  ;;  %s538_s13 = smov 32   ;;  %v90_v34 = vrot.slane %v83_v24, %v612_v17  ;;  %s539_s20 = smov 64  }
   0xc   :  { %71 = vrot.lane.b32.xlu0 %v70_v29, %s538_s13  ;;  %488 = vmatprep.subr.bf16.mxu1 %v535_v14  ;;  %v198_v35 = vld [vmem:[%s729_s5 + $0x20] sm:$0xff]  ;;  %v199_v36 = vld [vmem:[%s729_s5 + $0x28] sm:$0xff]  ;;  %v477_v37 = vpack.c.bf16 %v105_v32, %v104_v31  ;;  %v108_v42 = vld [vmem:[%s727_s3 + $0x50] sm:$0xff]  ;;  %vm94_vm1 = vcmask 261120   ;;  %vm96_vm2 = vcmask 523264   ;;  %vm117_vm3 = vcmask 785408  }
   0xd   :  { %v106_v38 = vld [vmem:[%s727_s3 + $0x40] sm:$0xff]  ;;  %v107_v39 = vld [vmem:[%s727_s3 + $0x48] sm:$0xff]  ;;  %v492_v40 = vpack.c.bf16 %v199_v36, %v198_v35  ;;  %v109_v43 = vld [vmem:[%s727_s3 + $0x58] sm:$0xff]  ;;  %s540_s2 = smov [#allocation2]   ;;  %vm362_vm6 = vcmask 9216  }
   0xe   :  { %475 = vmatpush3.bf16.msra.mxu0 %v474_v30  ;;  %v480_v41 = vpack.c.bf16 %v107_v39, %v106_v38  ;;  %v483_v44 = vpack.c.bf16 %v109_v43, %v108_v42  ;;  %v30_v45 = vld [vmem:[%s724_s0] sm:$0x1]  ;;  %v31_v46 = vld [vmem:[%s724_s0 + $0x1] sm:$0x1]  ;;  %v200_v54 = vld [vmem:[%s729_s5 + $0x30] sm:$0xff]  ;;  %s370_s18 = sshll.u32 %s540_s2, 4  ;;  %s371_s18 = int_to_ptr.vmem [resolvable:$true] %s370_s18 }
   0xf   :  { %476 = vmatprep.subr.bf16.mxu0 %v535_v14  ;;  %490 = vmatpush3.bf16.msra.mxu1 %v489_v33  ;;  %v38_v47 = vcombine.low %v30_v45, %v31_v46  ;;  %v201_v55 = vld [vmem:[%s729_s5 + $0x38] sm:$0xff]  ;;  %v378_v57 = vld [vmem:[%s728_s4] ss:$0 sm:$0xff]  ;;  %v286_v60 = vld [vmem:[%s731_s7 + $0x8] sm:$0xff]  ;;  %p515_p1 = scmp.lt.s32.totalorder %s371_s18, %s371_s18 }
  0x10   :  { %91 = vrot.lane.b32.xlu0 %v90_v34, %s539_s20  ;;  %491 = vmatprep.subr.bf16.mxu1 %v535_v14  ;;  %v495_v56 = vpack.c.bf16 %v201_v55, %v200_v54  ;;  %v285_v59 = vld [vmem:[%s731_s7] sm:$0xff]  ;;  %v287_v2 = vld [vmem:[%s731_s7 + $0x10] sm:$0xff]  ;;  %v288_v3 = vld [vmem:[%s731_s7 + $0x18] sm:$0xff]  ;;  %s510_s7 = scalar_lea.vmem %s371_s18, 32 }
  0x11   :  { %v45_v48 = vrot.slane %v38_v47, %v612_v17  ;;  %v498_v0 = vpack.c.bf16 %v286_v60, %v285_v59  ;;  %v501_v4 = vpack.c.bf16 %v288_v3, %v287_v2  ;;  %v380_v5 = vld [vmem:[%s730_s6] ss:$0 sm:$0xff]  ;;  %p511_p0 = scmp.ne.s32.totalorder %s371_s18, %s510_s7  ;;  %p516_p2 = scmp.lt.s32.totalorder %s510_s7, %s510_s7 }
  0x12   :  { %478 = vmatpush3.bf16.msra.mxu0 %v477_v37 }
  0x13   :  { %479 = vmatprep.subr.bf16.mxu0 %v535_v14  ;;  %493 = vmatpush3.bf16.msra.mxu1 %v492_v40  ;;  %v52_v50 = vrot.slane %v45_v48, %v612_v17  ;;  %p517_p3 = por %p516_p2, %p515_p1 }
  0x14   :  { %494 = vmatprep.subr.bf16.mxu1 %v535_v14 }
  0x15   :  { %p518_p4 = pnand %p517_p3, %p511_p0 }
  0x16   :  { %481 = vmatpush3.bf16.msra.mxu0 %v480_v41 }
  0x17   :  { %482 = vmatprep.subr.bf16.mxu0 %v535_v14  ;;  %496 = vmatpush3.bf16.msra.mxu1 %v495_v56 }
  0x18   :  { %497 = vmatprep.subr.bf16.mxu1 %v535_v14 }
  0x1a   :  { %484 = vmatpush3.bf16.msra.mxu0 %v483_v44 }
  0x7e   :  { %v72_v49 = vpop.permute.xlu0 %71 }
  0x7f   :  { %v95_v51 = vsel %vm94_vm1, %v52_v50, %v72_v49 }
  0x82   :  { %v92_v52 = vpop.permute.xlu0 %91 }
  0x83   :  { %v97_v53 = vsel %vm96_vm2, %v95_v51, %v92_v52 }
  0x84   :  { %435 = vmatmul.mubr.msk.f32.vlgmr.msra.gmra.mrb[0].mxu0 %vm117_vm3, %v97_v53 }
 0x157   :  { %v187_v58 = vpop.f32.mrb[0].mxu0 }
 0x158   :  { %v188_v61 = vadd.f32 %v378_v57, %v187_v58  ;;  %v436_v62 = vpop.f32.mrb[1].mxu0 }
 0x15a   :  { %vm191_vm4 = vcmp.ge.f32.partialorder %v188_v61, 0.0  ;;  %v192_v63 = vmul.f32 0.3, %v188_v61 }
 0x15c   :  { %v193_v1 = vsel %vm191_vm4, %v188_v61, %v192_v63 }
 0x15d   :  { %454 = vmatmul.mubr.msk.f32.vlgmr.msra.gmra.mrb[0].mxu1 %vm96_vm2, %v193_v1 }
 0x15e   :  { %499 = vmatpush3.bf16.msra.mxu1 %v498_v0  ;;  %464 = vmatprep.mubr.msk.f32.mxu1 %vm536_vm0, %v537_v19 }
 0x15f   :  { %500 = vmatprep.subr.bf16.mxu1 %v535_v14 }
 0x162   :  { %502 = vmatpush3.bf16.msra.mxu1 %v501_v4 }
 0x230   :  { %v278_v6 = vpop.f32.mrb[0].mxu1 }
 0x231   :  { %v279_v7 = vadd.f32 %v380_v5, %v278_v6  ;;  %v455_v8 = vpop.f32.mrb[1].mxu1 }
 0x233   :  { %vm282_vm5 = vcmp.ge.f32.partialorder %v279_v7, 0.0  ;;  %v283_v9 = vmul.f32 0.3, %v279_v7 }
 0x235   :  { %v284_v10 = vsel %vm282_vm5, %v279_v7, %v283_v9 }
 0x236   :  { %465 = vmatmul.mubr.msk.f32.vlgmr.msra.gmra.mrb[2].mxu1 %vm94_vm1, %v284_v10 }
 0x309   :  { %v358_v11 = vpop.f32.mrb[2].mxu1 }
 0x30a   :  { %363 = vst.msk [vmem:[#allocation2] sm:$0x3] %vm362_vm6, %v358_v11  ;;  %v466_v12 = vpop.f32.mrb[3].mxu1 }
 0x30b   :  { %521 = shalt.err (!%p518_p4)
}
 0x30c   :  { %s522_s20 = scalar_lea.hbm %s732_s8, 32 }
 0x30d   :  { %p523_p5 = scmp.ne.s32.totalorder %s732_s8, %s522_s20  ;;  %p526_p6 = scmp.lt.u32.totalorder %s522_s20, %s732_s8 }
 0x30f   :  { %p528_p7 = pnand %p526_p6, %p523_p5 }
 0x311   :  { %531 = shalt.err (!%p528_p7)
}
 0x312   :  { %373 = dma.vmem_to_hbm [thread:$0]  %s371_s18, 32, %s732_s8, [#allocation3]  }
 0x313   :  { %532 = dma.done.wait [#allocation3], 32  }
 0x314   :  { %533 = vsyncadd [#allocation3], 4294967264 }
 0x315   :  { %377 = vsyncpa [#allocation3], 1 }

</bundles_post_ra>
